<compile_context>
chip_gen: v6e
topology: v6e:2x2x1
jax: 0.10.0
libtpu: 0.0.40
codegen_flags: <defaults>
</compile_context>

<pallas_src>
import functools

import jax
import jax.numpy as jnp
from jax.experimental import pallas as pl
from jax.experimental.pallas import tpu as pltpu

BN_EPS = 1e-5
LANE = 128
_MB = 1 << 20
VMEM_RESIDENT_BUDGET = 40 * _MB   # keep resident-M path well under v7x's 64 MiB VMEM
VMEM_LIMIT_CAP = 48 * _MB


def _round_up(x, m):
    return (x + m - 1) // m * m


def _pick_tile(n, cap):
    """Largest multiple of 128 <= cap that divides n (n is a multiple of 128)."""
    t = max(LANE, (min(cap, n) // LANE) * LANE)
    while n % t:
        t -= LANE
    return t


def plan_tiles(n, *, tm_cap=1024, tk_cap=2048):
    """Choose (npad, tm, tk).

    npad is padded to a multiple of min(512, n128) so the row/reduction tiles never
    collapse to 128 (a 128-tile pipeline runs ~3x below HBM roofline); tm is additionally
    capped to ~npad/8 so large graphs keep >= 8 row tiles for v7x 2-core sharding."""
    n128 = _round_up(n, LANE)
    pad_unit = min(512, n128)
    npad = _round_up(n128, pad_unit)
    tm = _pick_tile(npad, min(tm_cap, max(512, npad // 8)))
    tk = _pick_tile(npad, tk_cap)
    return npad, tm, tk


# ----------------------------------------------------------------------------- kernels

def _transform_kernel(x_ref, w_ref, o_ref):
    """M = X @ W for one row tile (bf16 x bf16 MXU dot, f32 accumulate)."""
    o_ref[...] = jnp.dot(x_ref[...], w_ref[...],
                         preferred_element_type=jnp.float32).astype(o_ref.dtype)


def _accumulate(a_ref, m_ref, acc_ref, *, tk, m_resident):
    """acc += A_tile @ M_kslab, with f32 VMEM accumulator init at k == 0."""
    k = pl.program_id(1)

    @pl.when(k == 0)
    def _():
        acc_ref[...] = jnp.zeros_like(acc_ref)

    if m_resident:
        off = pl.multiple_of(k * tk, tk)
        m_slab = m_ref[pl.ds(off, tk), :]      # M is whole-array VMEM-resident
    else:
        m_slab = m_ref[...]                    # streamed (tk, d) slab
    acc_ref[...] += jnp.dot(a_ref[...], m_slab, preferred_element_type=jnp.float32)


def _prop_kernel(a_ref, m_ref, b_ref, o_ref, acc_ref, *, tk, m_resident, relu):
    """O = A_hat @ M + b (optionally ReLU), accumulated over the k grid axis."""
    _accumulate(a_ref, m_ref, acc_ref, tk=tk, m_resident=m_resident)

    @pl.when(pl.program_id(1) == pl.num_programs(1) - 1)
    def _():
        r = acc_ref[...] + b_ref[...]
        if relu:
            r = jnp.maximum(r, 0.0)
        o_ref[...] = r.astype(o_ref.dtype)


def _prop_fused_w2_kernel(a_ref, m_ref, b_ref, w2_ref, o_ref, acc_ref, *, tk, m_resident):
    """O = relu(A_hat @ M + b) @ W2 -- conv1 propagation with the second feature
    transform fused into the finalize (no h1 HBM round trip)."""
    _accumulate(a_ref, m_ref, acc_ref, tk=tk, m_resident=m_resident)

    @pl.when(pl.program_id(1) == pl.num_programs(1) - 1)
    def _():
        h = jnp.maximum(acc_ref[...] + b_ref[...], 0.0).astype(w2_ref.dtype)
        o_ref[...] = jnp.dot(h, w2_ref[...],
                             preferred_element_type=jnp.float32).astype(o_ref.dtype)


# ----------------------------------------------------------------------------- wrappers

def _feature_transform(x, w, *, tm):
    n, f = x.shape
    d = w.shape[1]
    return pl.pallas_call(
        _transform_kernel,
        out_shape=jax.ShapeDtypeStruct((n, d), jnp.bfloat16),
        grid=(n // tm,),
        in_specs=[pl.BlockSpec((tm, f), lambda i: (i, 0)),
                  pl.BlockSpec((f, d), lambda i: (0, 0))],
        out_specs=pl.BlockSpec((tm, d), lambda i: (i, 0)),
        compiler_params=pltpu.CompilerParams(dimension_semantics=("parallel",)),
    )(x, w)


def _propagate(a, m, bias, *, w2=None, relu=False, out_dtype=jnp.float32, tm, tk):
    """Tiled propagation O = A_hat @ M + b (optional ReLU / fused @W2).

    A_hat is streamed in (tm, tk) bf16 tiles; M is kept VMEM-resident (DMA'd once) when it
    fits the VMEM budget, otherwise streamed in (tk, d) k-slabs."""
    npad = a.shape[0]
    d_in = m.shape[1]
    d_out = d_in if w2 is None else w2.shape[1]
    out_itemsize = jnp.dtype(out_dtype).itemsize

    # Worst-case VMEM estimate (assume every BlockSpec input/output is double-buffered).
    def est(m_resident):
        m_bytes = 2 * (npad if m_resident else tk) * d_in * 2
        return (2 * tm * tk * 2                       # A_hat tiles (bf16)
                + m_bytes                             # M
                + 2 * tm * d_out * out_itemsize       # output tiles
                + tm * d_in * 4                       # f32 accumulator
                + (2 * d_in * d_out * 2 if w2 is not None else 0)
                + 4 * LANE * 128)                     # bias + slack

    m_resident = est(True) <= VMEM_RESIDENT_BUDGET
    vmem_limit = int(min(VMEM_LIMIT_CAP, max(32 * _MB, est(m_resident) + 4 * _MB)))

    if m_resident:
        # Full-array block, constant index_map -> DMA'd once, stays VMEM-resident.
        m_spec = pl.BlockSpec((npad, d_in), lambda i, k: (0, 0))
    else:
        m_spec = pl.BlockSpec((tk, d_in), lambda i, k: (k, 0))

    in_specs = [pl.BlockSpec((tm, tk), lambda i, k: (i, k)),     # A_hat tile (bf16)
                m_spec,                                          # M
                pl.BlockSpec((1, d_in), lambda i, k: (0, 0))]    # bias row
    operands = [a, m, bias]
    if w2 is None:
        kernel = functools.partial(_prop_kernel, tk=tk, m_resident=m_resident, relu=relu)
    else:
        kernel = functools.partial(_prop_fused_w2_kernel, tk=tk, m_resident=m_resident)
        in_specs.append(pl.BlockSpec((d_in, d_out), lambda i, k: (0, 0)))  # W2 resident
        operands.append(w2)

    cost = pl.CostEstimate(
        flops=2 * npad * npad * d_in + (2 * npad * d_in * d_out if w2 is not None else 0),
        transcendentals=0,
        bytes_accessed=int(a.size * a.dtype.itemsize + m.size * m.dtype.itemsize
                           + npad * d_out * out_itemsize),
    )
    return pl.pallas_call(
        kernel,
        out_shape=jax.ShapeDtypeStruct((npad, d_out), out_dtype),
        grid=(npad // tm, npad // tk),
        in_specs=in_specs,
        out_specs=pl.BlockSpec((tm, d_out), lambda i, k: (i, 0)),
        scratch_shapes=[pltpu.VMEM((tm, d_in), jnp.float32)],
        compiler_params=pltpu.CompilerParams(
            dimension_semantics=("parallel", "arbitrary"),
            vmem_limit_bytes=vmem_limit),
        cost_estimate=cost,
    )(*operands)


def fold_batchnorm(params):
    """Fold eval-mode BatchNorm1d into conv1's weight/bias."""
    s = params["bn_gamma"] * jax.lax.rsqrt(params["bn_var"] + BN_EPS)
    w1 = params["w1"] * s[None, :]
    b1 = (params["b1"] - params["bn_mean"]) * s + params["bn_beta"]
    return w1, b1


def pad_adjacency(adj_hat, npad):
    """Pad the dense GCN-normalized adjacency to (npad, npad) and cast to bf16.

    This is a full O(N^2) pass: do it ONCE per graph and cache the result (it is roughly
    the cost of one whole propagation)."""
    n = adj_hat.shape[0]
    return jnp.zeros((npad, npad), jnp.bfloat16).at[:n, :n].set(
        adj_hat.astype(jnp.bfloat16))


def gnnsafe_forward(a_pad, x, params, *, tm, tk):
    """Eval-mode GNNSafe forward: conv1 -> BN(folded) -> ReLU -> (dropout=id) -> conv2.

    a_pad: (npad, npad) bf16 padded GCN-normalized adjacency (see pad_adjacency).
    x:     (n, fin) f32 node features with n <= npad.
    """
    # TODO(synk): training-mode dropout / batch-statistics BN not implemented (eval only).
    npad = a_pad.shape[0]
    n, fin = x.shape
    h = params["w1"].shape[1]
    c = params["w2"].shape[1]
    hp = _round_up(h, LANE)
    cp = _round_up(c, LANE)

    # Fold BN into conv1; pad lane dims (H, C) to multiples of 128 so every matmul / store
    # is lane-dense.  Weights/activations in bf16, biases stay f32 (added to f32 acc).
    w1, b1 = fold_batchnorm(params)
    w1p = jnp.zeros((fin, hp), jnp.bfloat16).at[:, :h].set(w1.astype(jnp.bfloat16))
    b1p = jnp.zeros((1, hp), jnp.float32).at[:, :h].set(b1)
    w2p = jnp.zeros((hp, cp), jnp.bfloat16).at[:h, :c].set(
        params["w2"].astype(jnp.bfloat16))
    b2p = jnp.zeros((1, cp), jnp.float32).at[:, :c].set(params["b2"])

    x_p = jnp.zeros((npad, fin), jnp.bfloat16).at[:n, :].set(x.astype(jnp.bfloat16))

    # conv1 (+BN +ReLU) with fused H @ W2:  m2 = relu(A @ (X @ W1') + b1') @ W2
    m1 = _feature_transform(x_p, w1p, tm=tm)                                  # [Np,Hp] bf16
    m2 = _propagate(a_pad, m1, b1p, w2=w2p, out_dtype=jnp.bfloat16, tm=tm, tk=tk)

    # conv2 propagation:  out = A @ m2 + b2
    out = _propagate(a_pad, m2, b2p, relu=False, out_dtype=jnp.float32, tm=tm, tk=tk)
    return out[:n, :c]


# ----------------------------------------------------------------------------- graph / params glue

def build_gcn_adj(edge_index, num_nodes):
    """Dense GCN-normalized adjacency D^{-1/2} (A + I) D^{-1/2}.

    Scatter-add so duplicate edges accumulate (PyG scatter-add aggregation); self loops are
    added only for nodes without one (add_remaining_self_loops).  A[dst, src] = weight so
    messages flow src -> dst like PyG GCNConv."""
    row, col = edge_index[0], edge_index[1]
    a = jnp.zeros((num_nodes, num_nodes), jnp.float32)
    a = a.at[col, row].add(1.0)
    diag = jnp.diagonal(a)
    a = a + jnp.diag(jnp.where(diag > 0.0, 0.0, 1.0))
    deg = a.sum(axis=1)
    dinv = jnp.where(deg > 0, jax.lax.rsqrt(deg), 0.0)
    return dinv[:, None] * a * dinv[None, :]


def init_params(key, in_feature, hidden_feature, num_classes):
    k1, k2, k3, k4, k5, k6 = jax.random.split(key, 6)

    def glorot(k, fan_in, fan_out):
        limit = jnp.sqrt(6.0 / (fan_in + fan_out))
        return jax.random.uniform(k, (fan_in, fan_out), jnp.float32, -limit, limit)

    return {
        "w1": glorot(k1, in_feature, hidden_feature),
        "b1": jnp.zeros((hidden_feature,), jnp.float32),
        "w2": glorot(k2, hidden_feature, num_classes),
        "b2": jnp.zeros((num_classes,), jnp.float32),
        # non-trivial running stats so BN folding is actually exercised
        "bn_gamma": jax.random.uniform(k3, (hidden_feature,), jnp.float32, 0.5, 1.5),
        "bn_beta": jax.random.uniform(k4, (hidden_feature,), jnp.float32, -0.5, 0.5),
        "bn_mean": jax.random.uniform(k5, (hidden_feature,), jnp.float32, -0.5, 0.5),
        "bn_var": jax.random.uniform(k6, (hidden_feature,), jnp.float32, 0.5, 1.5),
    }


if __name__ == "__main__":
    # Small synthetic graph: N nodes, E directed edges (symmetrized).
    N, IN_F, HID, NUM_CLASSES, E = 256, 16, 32, 8, 512

    key = jax.random.PRNGKey(0)
    k_x, k_e1, k_e2, k_p = jax.random.split(key, 4)

    x = jax.random.normal(k_x, (N, IN_F), jnp.float32)
    src = jax.random.randint(k_e1, (E,), 0, N)
    dst = jax.random.randint(k_e2, (E,), 0, N)
    edge_index = jnp.stack([jnp.concatenate([src, dst]),
                            jnp.concatenate([dst, src])], axis=0)

    params = init_params(k_p, IN_F, HID, NUM_CLASSES)
    adj_hat = build_gcn_adj(edge_index, N)

    # Plan tiles once; pad + bf16-cast A_hat ONCE (cache a_pad for repeated inference).
    npad, tm, tk = plan_tiles(N)
    a_pad = pad_adjacency(adj_hat, npad)

    out = gnnsafe_forward(a_pad, x, params, tm=tm, tk=tk)
    out = jax.block_until_ready(out)

    # Pure-JAX f32 reference (eval mode); kernels use bf16 A / activations -> loose tol.
    scale = params["bn_gamma"] / jnp.sqrt(params["bn_var"] + BN_EPS)
    h_ref = adj_hat @ (x @ params["w1"]) + params["b1"]
    h_ref = (h_ref - params["bn_mean"]) * scale + params["bn_beta"]
    h_ref = jnp.maximum(h_ref, 0.0)
    out_ref = adj_hat @ (h_ref @ params["w2"]) + params["b2"]

    assert out.shape == (N, NUM_CLASSES)
    err = float(jnp.abs(out - out_ref).max())
    assert jnp.allclose(out, out_ref, atol=7.5e-2, rtol=7.5e-2), f"max abs err {err}"

    print("KERNEL_OK")
</pallas_src>

<mosaic_0001>
module attributes {stable_mosaic.version = 11 : i64} {
  func.func @_transform_kernel(%arg0: i32, %arg1: memref<256x16xbf16, #tpu.memory_space<vmem>>, %arg2: memref<16x128xbf16, #tpu.memory_space<vmem>>, %arg3: memref<256x128xbf16, #tpu.memory_space<vmem>>) attributes {dimension_semantics = [#tpu.dimension_semantics<parallel>], iteration_bounds = array<i64: 1>, scalar_prefetch = 0 : i64, scratch_operands = 0 : i64, tpu.core_type = #tpu.core_type<tc>, window_params = [{transform_indices = @transform_0, window_bounds = array<i64: 256, 16>}, {pipeline_mode = #tpu.pipeline_mode<synchronous>, transform_indices = @transform_1, window_bounds = array<i64: 16, 128>}, {transform_indices = @transform_2, window_bounds = array<i64: 256, 128>}]} {
    %c0 = arith.constant 0 : index
    %c0_0 = arith.constant 0 : index
    %0 = vector.load %arg1[%c0, %c0_0] : memref<256x16xbf16, #tpu.memory_space<vmem>>, vector<256x16xbf16>
    %c0_1 = arith.constant 0 : index
    %c0_2 = arith.constant 0 : index
    %1 = vector.load %arg2[%c0_1, %c0_2] : memref<16x128xbf16, #tpu.memory_space<vmem>>, vector<16x128xbf16>
    %cst = arith.constant dense<0.000000e+00> : vector<256x128xf32>
    %2 = tpu.matmul %0, %1, %cst {dimension_numbers = #tpu.dot_dimension_numbers<[1], [0], [0], [1], [0, 0, 1, 1], [], []>} : vector<256x16xbf16>, vector<16x128xbf16>, vector<256x128xf32> -> vector<256x128xf32>
    %3 = arith.truncf %2 : vector<256x128xf32> to vector<256x128xbf16>
    %c0_3 = arith.constant 0 : index
    %c0_4 = arith.constant 0 : index
    %4 = vector.load %arg3[%c0_3, %c0_4] : memref<256x128xbf16, #tpu.memory_space<vmem>>, vector<256x128xbf16>
    tpu.vector_store %arg3[%c0_3, %c0_4], %3 {strides = array<i32>} : memref<256x128xbf16, #tpu.memory_space<vmem>>, vector<256x128xbf16>,
    return
  }
  func.func @transform_0(%arg0: i32) -> (i32, i32) {
    %c0_i32 = arith.constant 0 : i32
    %c0_i32_0 = arith.constant 0 : i32
    return %arg0, %c0_i32 : i32, i32
  }
  func.func @transform_1(%arg0: i32) -> (i32, i32) {
    %c0_i32 = arith.constant 0 : i32
    %c0_i32_0 = arith.constant 0 : i32
    %c0_i32_1 = arith.constant 0 : i32
    return %c0_i32, %c0_i32_0 : i32, i32
  }
  func.func @transform_2(%arg0: i32) -> (i32, i32) {
    %c0_i32 = arith.constant 0 : i32
    %c0_i32_0 = arith.constant 0 : i32
    return %arg0, %c0_i32 : i32, i32
  }
}

</mosaic_0001>

<bundles_post_ra>
// kernel: tpu_custom_call.1
= control target key start
LH: loop header
LB: loop body
LE: loop exit
PB: predicated region body
PF: predicated region fallthrough
CT: control target
= control target key end

     0   :  { %vm133_vm0 = vcmask 130048   ;;  %s894_s0 = inlined_call_operand.vmem [shape: bf16[256,16], index: 0, kind: input, shape index: {}]   ;;  %s895_s1 = inlined_call_operand.vmem [shape: bf16[16,128], index: 1, kind: input, shape index: {}]   ;;  %s896_s2 = inlined_call_operand.hbm [shape: bf16[256,128], index: 2, kind: output, shape index: {}]  }
   0x1   :  { %v767_v0 = vld [vmem:[%s895_s1] sm:$0xff]   ;;  %v770_v3 = vld [vmem:[%s894_s0 + $0x8] sm:$0xff]   ;;  %v772_v5 = vld [vmem:[%s894_s0 + $0x10] sm:$0xff]  }
   0x2   :  { %v768_v1 = vld [vmem:[%s894_s0] sm:$0xff]   ;;  %728 = vmatprep.subr.bf16.mxu0 %v767_v0  ;;  %762 = vmatprep.subr.bf16.mxu1 %v767_v0  ;;  %v771_v4 = vld [vmem:[%s894_s0 + $0x48] sm:$0xff]   ;;  %v773_v6 = vld [vmem:[%s894_s0 + $0x50] sm:$0xff]  }
   0x3   :  { %v769_v2 = vld [vmem:[%s894_s0 + $0x40] sm:$0xff]   ;;  %729 = vmatpush3.bf16.msra.mxu0 %v767_v0  ;;  %763 = vmatpush3.bf16.msra.mxu1 %v767_v0  ;;  %v774_v7 = vld [vmem:[%s894_s0 + $0x18] sm:$0xff]  }
   0x4   :  { %730 = vmatprep.mubr.msk.bf16.mxu0 %vm133_vm0, %v768_v1  ;;  %746 = vmatprep.mubr.msk.bf16.mxu1 %vm133_vm0, %v769_v2  ;;  %v775_v8 = vld [vmem:[%s894_s0 + $0x58] sm:$0xff]   ;;  %v776_v9 = vld [vmem:[%s894_s0 + $0x20] sm:$0xff]  }
   0x5   :  { %v777_v10 = vld [vmem:[%s894_s0 + $0x60] sm:$0xff]  }
   0x6   :  { %731 = vmatmul.mubr.msk.bf16.vlgmr.msra.gmra.mxu0 %vm133_vm0, %v770_v3  ;;  %747 = vmatmul.mubr.msk.bf16.vlgmr.msra.gmra.mxu1 %vm133_vm0, %v771_v4 }
   0x7   :  { %734 = vmatprep.mubr.msk.bf16.mxu0 %vm133_vm0, %v772_v5  ;;  %750 = vmatprep.mubr.msk.bf16.mxu1 %vm133_vm0, %v773_v6 }
   0xe   :  { %735 = vmatmul.mubr.msk.bf16.gmra.mxu0 %vm133_vm0, %v774_v7  ;;  %751 = vmatmul.mubr.msk.bf16.gmra.mxu1 %vm133_vm0, %v775_v8 }
   0xf   :  { %738 = vmatprep.mubr.msk.bf16.mxu0 %vm133_vm0, %v776_v9  ;;  %754 = vmatprep.mubr.msk.bf16.mxu1 %vm133_vm0, %v777_v10 }
  0x10   :  { %7 = vsyncpa [#allocation3], 0  ;;  %v778_v11 = vld [vmem:[%s894_s0 + $0x28] sm:$0xff]   ;;  %v780_v13 = vld [vmem:[%s894_s0 + $0x30] sm:$0xff]  }
  0x11   :  { %v779_v12 = vld [vmem:[%s894_s0 + $0x68] sm:$0xff]   ;;  %v781_v14 = vld [vmem:[%s894_s0 + $0x70] sm:$0xff]   ;;  %v782_v15 = vld [vmem:[%s894_s0 + $0x38] sm:$0xff]  }
  0x12   :  { %v783_v16 = vld [vmem:[%s894_s0 + $0x78] sm:$0xff]   ;;  %s806_s0 = smov [#allocation2]  }
  0x13   :  { %s508_s14 = sshll.u32 %s806_s0, 4  ;;  %s509_s14 = int_to_ptr.vmem [resolvable:$true] %s508_s14 }
  0x14   :  { %s784_s15 = scalar_lea.vmem %s509_s14, 2048  ;;  %p789_p1 = scmp.lt.s32.totalorder %s509_s14, %s509_s14 }
  0x15   :  { %p785_p0 = scmp.ne.s32.totalorder %s509_s14, %s784_s15  ;;  %p790_p2 = scmp.lt.s32.totalorder %s784_s15, %s784_s15 }
  0x16   :  { %739 = vmatmul.mubr.msk.bf16.gmra.mxu0 %vm133_vm0, %v778_v11  ;;  %755 = vmatmul.mubr.msk.bf16.gmra.mxu1 %vm133_vm0, %v779_v12 }
  0x17   :  { %742 = vmatprep.mubr.msk.bf16.mxu0 %vm133_vm0, %v780_v13  ;;  %758 = vmatprep.mubr.msk.bf16.mxu1 %vm133_vm0, %v781_v14  ;;  %p791_p3 = por %p790_p2, %p789_p1 }
  0x19   :  { %p792_p4 = pnand %p791_p3, %p785_p0 }
  0x1e   :  { %743 = vmatmul.mubr.msk.bf16.gmra.mxu0 %vm133_vm0, %v782_v15  ;;  %759 = vmatmul.mubr.msk.bf16.gmra.mxu1 %vm133_vm0, %v783_v16 }
  0xc6   :  { %v732_v17 = vpop.f32.mrf.mxu0  ;;  %v748_v18 = vpop.f32.mrf.mxu1 }
  0xc8   :  { %v216_v19 = vpop.f32.mrf.mxu0  ;;  %v280_v20 = vpop.f32.mrf.mxu1 }
  0xca   :  { %v733_v21 = vpop.f32.mrf.mxu0  ;;  %v749_v22 = vpop.f32.mrf.mxu1 }
  0xcb   :  { %v624_v23 = vpack.c.bf16 %v733_v21, %v732_v17  ;;  %v664_v24 = vpack.c.bf16 %v749_v22, %v748_v18 }
  0xcc   :  { %v219_v25 = vpop.f32.mrf.mxu0  ;;  %v283_v26 = vpop.f32.mrf.mxu1 }
  0xcd   :  { %696 = vst [vmem:[#allocation2 + $0x8] sm:$0xff] %v624_v23   ;;  %704 = vst [vmem:[#allocation2 + $0x48] sm:$0xff] %v664_v24   ;;  %v619_v27 = vpack.c.bf16 %v219_v25, %v216_v19  ;;  %v659_v28 = vpack.c.bf16 %v283_v26, %v280_v20 }
  0xce   :  { %v736_v29 = vpop.f32.mrf.mxu0  ;;  %v752_v30 = vpop.f32.mrf.mxu1 }
  0xcf   :  { %620 = vst [vmem:[#allocation2] sm:$0xff] %v619_v27   ;;  %703 = vst [vmem:[#allocation2 + $0x40] sm:$0xff] %v659_v28  }
  0xd0   :  { %v232_v31 = vpop.f32.mrf.mxu0  ;;  %v296_v32 = vpop.f32.mrf.mxu1 }
  0xd2   :  { %v737_v33 = vpop.f32.mrf.mxu0  ;;  %v753_v34 = vpop.f32.mrf.mxu1 }
  0xd3   :  { %v634_v35 = vpack.c.bf16 %v737_v33, %v736_v29  ;;  %v674_v36 = vpack.c.bf16 %v753_v34, %v752_v30 }
  0xd4   :  { %v235_v37 = vpop.f32.mrf.mxu0  ;;  %v299_v38 = vpop.f32.mrf.mxu1 }
  0xd5   :  { %698 = vst [vmem:[#allocation2 + $0x18] sm:$0xff] %v634_v35   ;;  %706 = vst [vmem:[#allocation2 + $0x58] sm:$0xff] %v674_v36   ;;  %v629_v39 = vpack.c.bf16 %v235_v37, %v232_v31  ;;  %v669_v40 = vpack.c.bf16 %v299_v38, %v296_v32 }
  0xd6   :  { %v740_v41 = vpop.f32.mrf.mxu0  ;;  %v756_v42 = vpop.f32.mrf.mxu1 }
  0xd7   :  { %697 = vst [vmem:[#allocation2 + $0x10] sm:$0xff] %v629_v39   ;;  %705 = vst [vmem:[#allocation2 + $0x50] sm:$0xff] %v669_v40  }
  0xd8   :  { %v248_v43 = vpop.f32.mrf.mxu0  ;;  %v312_v44 = vpop.f32.mrf.mxu1 }
  0xda   :  { %v741_v45 = vpop.f32.mrf.mxu0  ;;  %v757_v46 = vpop.f32.mrf.mxu1 }
  0xdb   :  { %v644_v47 = vpack.c.bf16 %v741_v45, %v740_v41  ;;  %v684_v48 = vpack.c.bf16 %v757_v46, %v756_v42 }
  0xdc   :  { %v251_v49 = vpop.f32.mrf.mxu0  ;;  %v315_v50 = vpop.f32.mrf.mxu1 }
  0xdd   :  { %700 = vst [vmem:[#allocation2 + $0x28] sm:$0xff] %v644_v47   ;;  %708 = vst [vmem:[#allocation2 + $0x68] sm:$0xff] %v684_v48   ;;  %v639_v51 = vpack.c.bf16 %v251_v49, %v248_v43  ;;  %v679_v52 = vpack.c.bf16 %v315_v50, %v312_v44 }
  0xde   :  { %v744_v53 = vpop.f32.mrf.mxu0  ;;  %v760_v54 = vpop.f32.mrf.mxu1 }
  0xdf   :  { %699 = vst [vmem:[#allocation2 + $0x20] sm:$0xff] %v639_v51   ;;  %707 = vst [vmem:[#allocation2 + $0x60] sm:$0xff] %v679_v52  }
  0xe0   :  { %v264_v55 = vpop.f32.mrf.mxu0  ;;  %v328_v56 = vpop.f32.mrf.mxu1 }
  0xe2   :  { %v745_v57 = vpop.f32.mrf.mxu0  ;;  %v761_v58 = vpop.f32.mrf.mxu1 }
  0xe3   :  { %v654_v59 = vpack.c.bf16 %v745_v57, %v744_v53  ;;  %v694_v60 = vpack.c.bf16 %v761_v58, %v760_v54 }
  0xe4   :  { %v267_v61 = vpop.f32.mrf.mxu0  ;;  %v331_v62 = vpop.f32.mrf.mxu1 }
  0xe5   :  { %702 = vst [vmem:[#allocation2 + $0x38] sm:$0xff] %v654_v59   ;;  %710 = vst [vmem:[#allocation2 + $0x78] sm:$0xff] %v694_v60   ;;  %v649_v63 = vpack.c.bf16 %v267_v61, %v264_v55  ;;  %v689_v0 = vpack.c.bf16 %v331_v62, %v328_v56 }
  0xe7   :  { %701 = vst [vmem:[#allocation2 + $0x30] sm:$0xff] %v649_v63   ;;  %709 = vst [vmem:[#allocation2 + $0x70] sm:$0xff] %v689_v0  }
  0xe8   :  { %795 = shalt.err (!%p792_p4)
}
  0xe9   :  { %s807_s16 = smov 64   ;;  %s808_s1 = smov 4  }
  0xea   :  { %514 = dma.vmem_to_hbm [thread:$0]  %s509_s14, 2048, %s896_s2, [#allocation3], %s807_s16, %s807_s16, %s808_s1  }
  0xeb   :  { %804 = dma.done.wait [#allocation3], 2048  }
  0xec   :  { %805 = vsyncadd [#allocation3], 4294965248 }
  0xed   :  { %518 = vsyncpa [#allocation3], 1 }

</bundles_post_ra>
